<compile_context>
chip_gen: v7x
topology: tpu7x:2x2x1
jax: 0.10.0
libtpu: 0.0.40
codegen_flags: <defaults>
</compile_context>

<pallas_src>
import jax
import jax.numpy as jnp
import numpy as np
from jax import lax
from jax.experimental import pallas as pl
from jax.experimental.pallas import tpu as pltpu

EPS = 1e-5                      # torch GroupNorm default eps
_BF = jnp.bfloat16


# ---------------------------------------------------------------- in-kernel helpers
def _group_norm(t, gamma, beta, gmat):
    """Centered two-pass GroupNorm for one batch element.

    t: (M, C) with M collapsing all spatial dims; gamma/beta: (1, C);
    gmat: (G, C) one-hot group-membership rows (G small and static).
    Group statistics are accumulated in f32 on the VPU (no MXU, no reshapes).
    """
    M, C = t.shape
    G = gmat.shape[0]
    cnt = float(M * (C // G))
    s1 = jnp.sum(t, axis=0, keepdims=True)                     # (1, C)
    mean_c = jnp.zeros((1, C), jnp.float32)
    for g in range(G):
        row = gmat[g:g + 1, :]
        mean_c = mean_c + row * (jnp.sum(s1 * row) / cnt)
    d = t - mean_c
    s2 = jnp.sum(d * d, axis=0, keepdims=True)                 # (1, C)
    var_c = jnp.zeros((1, C), jnp.float32)
    for g in range(G):
        row = gmat[g:g + 1, :]
        var_c = var_c + row * (jnp.sum(s2 * row) / cnt)
    return d * lax.rsqrt(var_c + EPS) * gamma + beta


# ---------------------------------------------------------------- fused block kernel
def _block_kernel(x_ref, idx_ref, rel_ref,
                  w1t_ref, g1_ref, b1_ref,
                  wqt_ref, bq_ref, wkt_ref, bk_ref, wvt_ref, bv_ref,
                  wp1t_ref, gnp_g_ref, gnp_b_ref, wp2t_ref, bp2_ref,
                  ga1_g_ref, ga1_b_ref, wa1t_ref,
                  ga2_g_ref, ga2_b_ref, wa2t_ref, ba2_ref,
                  bn_g_ref, bn_b_ref, w2t_ref, bn2_g_ref, bn2_b_ref,
                  gmat_ref, o_ref):
    _, N, C = x_ref.shape
    _, M, _ = idx_ref.shape
    K = M // N
    gmat = gmat_ref[...]

    # ---- pre: linear1 (no bias) -> GroupNorm -> ReLU
    x = x_ref[0]                                                        # (N, C) f32
    h = jnp.dot(x.astype(_BF), w1t_ref[...], preferred_element_type=jnp.float32)
    h = jnp.maximum(_group_norm(h, g1_ref[...], b1_ref[...], gmat), 0.0)
    hb = h.astype(_BF)

    # ---- q / k / v 1x1 convs (+bias), bf16 operands, f32 accumulation
    q = jnp.dot(hb, wqt_ref[...], preferred_element_type=jnp.float32) + bq_ref[...]
    k = jnp.dot(hb, wkt_ref[...], preferred_element_type=jnp.float32) + bk_ref[...]
    v = jnp.dot(hb, wvt_ref[...], preferred_element_type=jnp.float32) + bv_ref[...]

    # ---- in-kernel neighbor gather via one-hot selection matmul on the MXU.
    # sel[m, j] = 1 iff grouped slot m (= query n, neighbor kk) selects point j.
    # f32 operands with a one-hot LHS -> (near-)exact gather; contraction dim is only N,
    # so the f32 passes are negligible MXU work.
    ids = idx_ref[0]                                                    # (M, 1) int32
    sel = jnp.where(lax.broadcasted_iota(jnp.int32, (M, N), 1) == ids, 1.0, 0.0)
    nk = jnp.dot(sel, k, preferred_element_type=jnp.float32)            # (M, C) grouped keys
    nv = jnp.dot(sel, v, preferred_element_type=jnp.float32)            # (M, C) grouped values

    # ---- to_pos_enc: Conv2d(3->3, no bias) -> GroupNorm(1,3) -> ReLU -> Conv2d(3->C)
    # The 3-channel contractions run as rank-1 broadcast FMAs on the VPU
    # (no lane-sparse MXU pushes with contraction dim 3).
    rel = rel_ref[0]                                                    # (M, 3)
    wp1t = wp1t_ref[...]                                                # (3, 3) rows = input ch
    h3 = (rel[:, 0:1] * wp1t[0:1, :] +
          rel[:, 1:2] * wp1t[1:2, :] +
          rel[:, 2:3] * wp1t[2:3, :])                                   # (M, 3)
    cnt3 = 3.0 * M                                                      # GroupNorm(1, 3)
    mean3 = jnp.sum(h3) / cnt3
    hc3 = h3 - mean3
    var3 = jnp.sum(hc3 * hc3) / cnt3
    g3 = jnp.maximum(hc3 * lax.rsqrt(var3 + EPS) * gnp_g_ref[...] + gnp_b_ref[...], 0.0)
    wp2t = wp2t_ref[...]                                                # (3, C)
    n_r = (g3[:, 0:1] * wp2t[0:1, :] +
           g3[:, 1:2] * wp2t[1:2, :] +
           g3[:, 2:3] * wp2t[2:3, :] + bp2_ref[...])                    # (M, C)

    # ---- attention MLP on (q - grouped_k + pos_enc)
    qx = jnp.broadcast_to(q[:, None, :], (N, K, C)).reshape(M, C)
    a = qx - nk + n_r                                                   # (M, C)
    a = jnp.maximum(_group_norm(a, ga1_g_ref[...], ga1_b_ref[...], gmat), 0.0)
    a = jnp.dot(a.astype(_BF), wa1t_ref[...], preferred_element_type=jnp.float32)
    a = jnp.maximum(_group_norm(a, ga2_g_ref[...], ga2_b_ref[...], gmat), 0.0)
    a = jnp.dot(a.astype(_BF), wa2t_ref[...],
                preferred_element_type=jnp.float32) + ba2_ref[...]

    # ---- softmax over the K neighbors (EUP exp + approx reciprocal), weighted sum
    a3 = a.reshape(N, K, C)
    a3 = a3 - jnp.max(a3, axis=1, keepdims=True)
    e = jnp.exp(a3)
    w = e * pl.reciprocal(jnp.sum(e, axis=1, keepdims=True), approx=True)
    nv3 = (nv + n_r).reshape(N, K, C)                                   # grouped_v + pos_enc
    y = jnp.sum(nv3 * w, axis=1)                                        # (N, C)

    # ---- tail: relu(bn(y)) -> linear2 -> bn2 -> + x -> relu
    t = jnp.maximum(_group_norm(y, bn_g_ref[...], bn_b_ref[...], gmat), 0.0)
    t = jnp.dot(t.astype(_BF), w2t_ref[...], preferred_element_type=jnp.float32)
    t = _group_norm(t, bn2_g_ref[...], bn2_b_ref[...], gmat)
    o_ref[0] = jnp.maximum(t + x, 0.0)


def _pairdist_kernel(pa_ref, pbt_ref, o_ref):
    # squared pairwise distances: pa = [p, 1, |p|^2, 0..], pbT = [-2p, |p|^2, 1, 0..]^T
    o_ref[0] = jnp.dot(pa_ref[0], pbt_ref[0], preferred_element_type=jnp.float32)


# ---------------------------------------------------------------- pallas_call wrappers
def _batched_spec(shape):
    rank = len(shape)
    return pl.BlockSpec((1,) + tuple(shape[1:]),
                        lambda b, _r=rank: (b,) + (0,) * (_r - 1))


def _full_spec(shape):
    rank = len(shape)
    return pl.BlockSpec(tuple(shape), lambda b, _r=rank: (0,) * _r)


_CPARAMS = pltpu.CompilerParams(dimension_semantics=("parallel",))


def fused_block(x, idx_col, rel, KP):
    # TODO(synk): for large N, tile this kernel over query rows (grid=(B, N//TN)); the
    # selection matrix becomes (TN*K, N) and k/v must stay N-resident — budget the VMEM
    # against ~64 MiB on v7x vs 128 MiB on v5e/v6e.
    B, N, C = x.shape
    out_shape = (B, N, C)
    args = [x, idx_col, rel,
            KP['w1t'], KP['bn1_g'], KP['bn1_b'],
            KP['wqt'], KP['bq'], KP['wkt'], KP['bk'], KP['wvt'], KP['bv'],
            KP['wp1t'], KP['gnp_g'], KP['gnp_b'], KP['wp2t'], KP['bp2'],
            KP['ga1_g'], KP['ga1_b'], KP['wa1t'],
            KP['ga2_g'], KP['ga2_b'], KP['wa2t'], KP['ba2'],
            KP['bn_g'], KP['bn_b'], KP['w2t'], KP['bn2_g'], KP['bn2_b'],
            KP['gmat']]
    specs = ([_batched_spec(a.shape) for a in args[:3]] +
             [_full_spec(a.shape) for a in args[3:]])
    return pl.pallas_call(
        _block_kernel,
        out_shape=jax.ShapeDtypeStruct(out_shape, jnp.float32),
        grid=(B,),
        in_specs=specs,
        out_specs=_batched_spec(out_shape),
        compiler_params=_CPARAMS,
    )(*args)


def pairwise_sqdist(p):
    # TODO(synk): for large N, tile the (N, N) output over rows (grid=(B, N//TM)).
    B, N, _ = p.shape
    sq = jnp.sum(p * p, axis=-1, keepdims=True)
    ones = jnp.ones_like(sq)
    zeros = jnp.zeros((B, N, 3), p.dtype)
    pa = jnp.concatenate([p, ones, sq, zeros], axis=-1)             # (B, N, 8)
    pb = jnp.concatenate([-2.0 * p, sq, ones, zeros], axis=-1)      # (B, N, 8)
    pbt = jnp.transpose(pb, (0, 2, 1))                              # (B, 8, N)
    out_shape = (B, N, N)
    return pl.pallas_call(
        _pairdist_kernel,
        out_shape=jax.ShapeDtypeStruct(out_shape, jnp.float32),
        grid=(B,),
        in_specs=[_batched_spec(pa.shape), _batched_spec(pbt.shape)],
        out_specs=_batched_spec(out_shape),
        compiler_params=_CPARAMS,
    )(pa, pbt)


# ---------------------------------------------------------------- parameter prep
def prep_kernel_params(P):
    """Pre-transpose 1x1-conv weights to (Cin, Cout) and pre-cast the MXU weights to
    bf16 once, outside the kernels (f32 accumulation via preferred_element_type)."""
    C = P['w1'].shape[0]
    wq, wk, wv = P['w_qkv'][:C], P['w_qkv'][C:2 * C], P['w_qkv'][2 * C:]
    bq, bk, bv = P['b_qkv'][:, :C], P['b_qkv'][:, C:2 * C], P['b_qkv'][:, 2 * C:]
    return {
        'w1t':   P['w1'].T.astype(_BF),
        'bn1_g': P['bn1_g'], 'bn1_b': P['bn1_b'],
        'wqt':   wq.T.astype(_BF), 'bq': bq,
        'wkt':   wk.T.astype(_BF), 'bk': bk,
        'wvt':   wv.T.astype(_BF), 'bv': bv,
        'wp1t':  P['wp1'].T,                         # (3, 3)  f32 -> VPU FMAs
        'gnp_g': P['gnp_g'], 'gnp_b': P['gnp_b'],    # (1, 3)
        'wp2t':  P['wp2'].T, 'bp2': P['bp2'],        # (3, C)  f32 -> VPU FMAs
        'ga1_g': P['ga1_g'], 'ga1_b': P['ga1_b'],
        'wa1t':  P['wa1'].T.astype(_BF),
        'ga2_g': P['ga2_g'], 'ga2_b': P['ga2_b'],
        'wa2t':  P['wa2'].T.astype(_BF), 'ba2': P['ba2'],
        'bn_g':  P['bn_g'], 'bn_b': P['bn_b'],
        'w2t':   P['w2'].T.astype(_BF),
        'bn2_g': P['bn2_g'], 'bn2_b': P['bn2_b'],
        'gmat':  P['gmatc'],
    }


# ---------------------------------------------------------------- full block forward
def point_transformer_block(p, x, idx, P):
    """idx: (B, N, K) precomputed kNN indices (pointops.QueryAndGroup knnquery)."""
    B, N, C = x.shape
    K = idx.shape[-1]
    KP = prep_kernel_params(P)

    # Data-dependent neighbor bookkeeping stays in XLA glue but only for tiny tensors:
    # flat neighbor indices (int32, 1 lane) and exact relative coordinates (3 lanes).
    # The C-channel grouped keys/values are gathered INSIDE the kernel (one-hot MXU matmul),
    # so the previous K-fold duplicated (B, N*K, C) nk/nv HBM round trips are gone.
    idx_col = idx.reshape(B, N * K, 1).astype(jnp.int32)
    gather = jax.vmap(lambda f, i: f[i])
    rel = (gather(p, idx) - p[:, :, None, :]).reshape(B, N * K, 3)

    out = fused_block(x, idx_col, rel, KP)                       # (B, N, C)
    return p, out


# ---------------------------------------------------------------- pure-JAX reference
def _gn_ref(t, gamma, beta, G):
    B, C = t.shape[0], t.shape[-1]
    tr = t.reshape(B, -1, G, C // G)
    mean = tr.mean(axis=(1, 3), keepdims=True)
    var = ((tr - mean) ** 2).mean(axis=(1, 3), keepdims=True)
    out = (tr - mean) / jnp.sqrt(var + EPS)
    return out.reshape(t.shape) * gamma + beta


def reference_block(p, x, idx, P):
    B, N, C = x.shape
    G = C // 16
    relu = lambda t: jnp.maximum(t, 0.0)
    # C-contraction 1x1 convs at the same numeric contract the kernel uses:
    # bf16 operands, f32 accumulation.
    lin2 = lambda t, w: jnp.einsum('bnc,dc->bnd', t.astype(_BF), w.astype(_BF),
                                   preferred_element_type=jnp.float32)
    lin4 = lambda t, w: jnp.einsum('bnkc,dc->bnkd', t.astype(_BF), w.astype(_BF),
                                   preferred_element_type=jnp.float32)
    # 3-channel pos-enc convs stay f32 (the kernel computes them exactly on the VPU).
    lin4f = lambda t, w: jnp.einsum('bnkc,dc->bnkd', t, w)
    y = relu(_gn_ref(lin2(x, P['w1']), P['bn1_g'], P['bn1_b'], G))
    qkv = lin2(y, P['w_qkv']) + P['b_qkv']
    q, k, v = qkv[..., :C], qkv[..., C:2 * C], qkv[..., 2 * C:]
    gather = jax.vmap(lambda f, i: f[i])
    rel = gather(p, idx) - p[:, :, None, :]
    nk = gather(k, idx)
    nv = gather(v, idx)
    h = relu(_gn_ref(lin4f(rel, P['wp1']), P['gnp_g'], P['gnp_b'], 1))
    n_r = lin4f(h, P['wp2']) + P['bp2']
    n_v = nv + n_r
    a = q[:, :, None, :] - nk + n_r
    a = relu(_gn_ref(a, P['ga1_g'], P['ga1_b'], G))
    a = lin4(a, P['wa1'])
    a = relu(_gn_ref(a, P['ga2_g'], P['ga2_b'], G))
    a = lin4(a, P['wa2']) + P['ba2']
    a = jax.nn.softmax(a, axis=2)
    yt = jnp.sum(n_v * a, axis=2)
    y2 = relu(_gn_ref(yt, P['bn_g'], P['bn_b'], G))
    y3 = _gn_ref(lin2(y2, P['w2']), P['bn2_g'], P['bn2_b'], G)
    return relu(y3 + x)


# ---------------------------------------------------------------- parameter init
def init_params(key, C):
    G = C // 16
    ks = jax.random.split(key, 26)
    w = lambda k, shape, s=0.2: (s * jax.random.normal(k, shape)).astype(jnp.float32)
    gamma = lambda k, c=C: (1.0 + 0.1 * jax.random.normal(k, (1, c))).astype(jnp.float32)
    beta = lambda k, c=C: (0.1 * jax.random.normal(k, (1, c))).astype(jnp.float32)
    P = {}
    P['w1'] = w(ks[0], (C, C))
    P['bn1_g'], P['bn1_b'] = gamma(ks[1]), beta(ks[2])
    wq, wk, wv = w(ks[3], (C, C)), w(ks[4], (C, C)), w(ks[5], (C, C))
    bq, bk, bv = beta(ks[6]), beta(ks[7]), beta(ks[8])
    P['w_qkv'] = jnp.concatenate([wq, wk, wv], axis=0)           # (3C, C)
    P['b_qkv'] = jnp.concatenate([bq, bk, bv], axis=1)           # (1, 3C)
    P['wp1'] = w(ks[9], (3, 3), 0.5)
    P['gnp_g'], P['gnp_b'] = gamma(ks[10], 3), beta(ks[11], 3)
    P['wp2'], P['bp2'] = w(ks[12], (C, 3), 0.5), beta(ks[13])
    P['ga1_g'], P['ga1_b'] = gamma(ks[14]), beta(ks[15])
    P['wa1'] = w(ks[16], (C, C))
    P['ga2_g'], P['ga2_b'] = gamma(ks[17]), beta(ks[18])
    P['wa2'], P['ba2'] = w(ks[19], (C, C)), beta(ks[20])
    P['bn_g'], P['bn_b'] = gamma(ks[21]), beta(ks[22])
    P['w2'] = w(ks[23], (C, C))
    P['bn2_g'], P['bn2_b'] = gamma(ks[24]), beta(ks[25])
    # group-membership one-hot rows used by the in-kernel GroupNorm
    P['gmatc'] = (jnp.arange(C)[None, :] // 16 ==
                  jnp.arange(G)[:, None]).astype(jnp.float32)    # (G, C)
    return P


# ---------------------------------------------------------------- main
if __name__ == "__main__":
    B, N, C, K = 2, 64, 32, 16
    key = jax.random.PRNGKey(0)
    kp, kx, kw = jax.random.split(key, 3)
    p = jax.random.uniform(kp, (B, N, 3), jnp.float32)
    x = (0.5 * jax.random.normal(kx, (B, N, C))).astype(jnp.float32)
    P = init_params(kw, C)

    # kNN: pairwise squared distances via Pallas; top-k selection stays in glue.
    # TODO(synk): the top-k neighbor selection (pointops knnquery) has no clean Pallas
    # equivalent; it remains XLA glue.
    d = jax.block_until_ready(pairwise_sqdist(p))
    d_ref = jnp.sum((p[:, :, None, :] - p[:, None, :, :]) ** 2, axis=-1)
    # distances are only used to pick neighbors; loose tolerance covers MXU precision
    np.testing.assert_allclose(np.asarray(d), np.asarray(d_ref), rtol=5e-2, atol=5e-2)
    _, idx = lax.top_k(-d, K)                                    # (B, N, K)

    p_out, y = point_transformer_block(p, x, idx, P)
    y = jax.block_until_ready(y)

    y_ref = reference_block(p, x, idx, P)
    np.testing.assert_allclose(np.asarray(y), np.asarray(y_ref), rtol=2e-2, atol=2e-2)
    assert y.shape == (B, N, C) and p_out.shape == (B, N, 3)
    print("KERNEL_OK")
</pallas_src>

<mosaic_0001>
module attributes {stable_mosaic.version = 11 : i64} {
  func.func @_pairdist_kernel(%arg0: i32, %arg1: memref<1x64x8xf32, #tpu.memory_space<vmem>>, %arg2: memref<1x8x64xf32, #tpu.memory_space<vmem>>, %arg3: memref<1x64x64xf32, #tpu.memory_space<vmem>>) attributes {dimension_semantics = [#tpu.dimension_semantics<parallel>], iteration_bounds = array<i64: 2>, scalar_prefetch = 0 : i64, scratch_operands = 0 : i64, tpu.core_type = #tpu.core_type<tc>, window_params = [{transform_indices = @transform_0, window_bounds = array<i64: 1, 64, 8>}, {transform_indices = @transform_1, window_bounds = array<i64: 1, 8, 64>}, {transform_indices = @transform_2, window_bounds = array<i64: 1, 64, 64>}]} {
    %c0 = arith.constant 0 : index
    %c0_0 = arith.constant 0 : index
    %c0_1 = arith.constant 0 : index
    %0 = vector.load %arg1[%c0, %c0_0, %c0_1] : memref<1x64x8xf32, #tpu.memory_space<vmem>>, vector<1x64x8xf32>
    %1 = vector.shape_cast %0 : vector<1x64x8xf32> to vector<64x8xf32>
    %c0_2 = arith.constant 0 : index
    %c0_3 = arith.constant 0 : index
    %c0_4 = arith.constant 0 : index
    %2 = vector.load %arg2[%c0_2, %c0_3, %c0_4] : memref<1x8x64xf32, #tpu.memory_space<vmem>>, vector<1x8x64xf32>
    %3 = vector.shape_cast %2 : vector<1x8x64xf32> to vector<8x64xf32>
    %cst = arith.constant dense<0.000000e+00> : vector<64x64xf32>
    %4 = tpu.matmul %1, %3, %cst {dimension_numbers = #tpu.dot_dimension_numbers<[1], [0], [0], [1], [0, 0, 1, 1], [], []>} : vector<64x8xf32>, vector<8x64xf32>, vector<64x64xf32> -> vector<64x64xf32>
    %c0_5 = arith.constant 0 : index
    %c0_6 = arith.constant 0 : index
    %c0_7 = arith.constant 0 : index
    %5 = vector.load %arg3[%c0_5, %c0_6, %c0_7] : memref<1x64x64xf32, #tpu.memory_space<vmem>>, vector<1x64x64xf32>
    %6 = vector.shape_cast %5 : vector<1x64x64xf32> to vector<64x64xf32>
    %7 = vector.shape_cast %4 : vector<64x64xf32> to vector<1x64x64xf32>
    tpu.vector_store %arg3[%c0_5, %c0_6, %c0_7], %7 {strides = array<i32>} : memref<1x64x64xf32, #tpu.memory_space<vmem>>, vector<1x64x64xf32>,
    return
  }
  func.func @transform_0(%arg0: i32) -> (i32, i32, i32) {
    %c0_i32 = arith.constant 0 : i32
    %c0_i32_0 = arith.constant 0 : i32
    %c0_i32_1 = arith.constant 0 : i32
    return %arg0, %c0_i32, %c0_i32_0 : i32, i32, i32
  }
  func.func @transform_1(%arg0: i32) -> (i32, i32, i32) {
    %c0_i32 = arith.constant 0 : i32
    %c0_i32_0 = arith.constant 0 : i32
    %c0_i32_1 = arith.constant 0 : i32
    return %arg0, %c0_i32, %c0_i32_0 : i32, i32, i32
  }
  func.func @transform_2(%arg0: i32) -> (i32, i32, i32) {
    %c0_i32 = arith.constant 0 : i32
    %c0_i32_0 = arith.constant 0 : i32
    %c0_i32_1 = arith.constant 0 : i32
    return %arg0, %c0_i32, %c0_i32_0 : i32, i32, i32
  }
}

</mosaic_0001>

<bundles_post_ra>
// kernel: tpu_custom_call.1
= control target key start
LH: loop header
LB: loop body
LE: loop exit
PB: predicated region body
PF: predicated region fallthrough
CT: control target
= control target key end

     0   :  { %7 = vsyncpa [#allocation3], 0  ;;  %s688_s0 = inlined_call_operand.vmem [shape: f32[2,64,8], index: 0, kind: input, shape index: {}]   ;;  %s689_s1 = inlined_call_operand.vmem [shape: f32[2,8,64], index: 1, kind: input, shape index: {}]   ;;  %s690_s2 = inlined_call_operand.hbm [shape: f32[2,64,64], index: 2, kind: output, shape index: {}]  }
   0x1   :  { %9 = vsyncpa [#allocation3 + $0x1], 0  ;;  %s566_s9 = smov 0   ;;  %s568_s10 = smov 0  }
   0x2   :  { %s570_s11 = smov 0   ;;  %s572_s12 = smov 0  }
   0x3 LB: > { %s587_s13 = sadd.s32 4294967295, %s546_s12   ;;  %s395_s14 = sadd.s32 4294967294, %s546_s12   ;;  %s546_s12 = sphi %s572_s12, %s696_s12   ;;  %s542_s11 = sphi %s570_s11, %s695_s11   ;;  %s538_s10 = sphi %s568_s10, %s694_s10   ;;  %s534_s9 = sphi %s566_s9, %s693_s9  }
   0x4   : > { %s591_s15 = sadd.s32 1, %s546_s12   ;;  %s74_s16 = sadd.s32 1, %s542_s11 }
   0x5   : > { %s71_s17 = ssub.s32 %s546_s12, %s591_s15  ;;  %p84_p0 = scmp.ne.s32.totalorder %s542_s11, %s538_s10 }
   0x6   : > { %p72_p1 = scmp.eq.s32.totalorder %s71_s17, 0  ;;  %p85_p2 = scmp.eq.s32.totalorder %s587_s13, 1 }
   0x7   : > { %p90_p3 = scmp.ne.s32.totalorder %s538_s10, %s534_s9  ;;  %p91_p4 = scmp.eq.s32.totalorder %s395_s14, 1 }
   0x8   : > { %s602_s18 = scalar_select %p72_p1, %s542_s11, %s74_s16  }
   0x9   : > { %p604_p5 = por %p85_p2, %p84_p0  ;;  %p608_p6 = por %p91_p4, %p90_p3 }
   0xa   : > { %p398_p7 = scmp.ge.s32.totalorder %s546_s12, 1  ;;  %p124_p8 = scmp.lt.s32.totalorder %s546_s12, 3 }
   0xc   : > { %p125_p9 = pnand %p398_p7, %p124_p8 }
   0xd   : > { %p150_p10 = scmp.lt.s32.totalorder (!%p125_p9), %s587_s13, 1  ;;  %vm168_vm0 = vcmask (!%p125_p9), 64512   ;;  %s147_s30 = sand.u32 (!%p125_p9), 1, %s538_s10   ;;  %vm298_vm1 = vcmask (!%p125_p9), 523264  }
   0xe   : > { %128 = sbr.rel (%p125_p9) target bundleno = 261 (0x105), region = 28  ;;  %s399_s3 = sshll.u32 (!%p125_p9), %s147_s30, 6 }
   0xf   : > { %s417_s4 = sshll.u32 (!%p125_p9), %s587_s13, 10  ;;  %s149_s5 = scalar_lea.vmem (!%p125_p9), [#allocation2], %s399_s3 }
  0x10   : > { %s321_s6 = sshll.u32 (!%p125_p9), %s149_s5, 4  ;;  %s639_s14 = scalar_lea.hbm (!%p125_p9), %s690_s2, %s417_s4  ;;  %s641_s6 = int_to_ptr.vmem [resolvable:$true] %s321_s6 }
  0x11   : > { %s484_s16 = scalar_lea.vmem (!%p125_p9), %s641_s6, 1024  ;;  %s548_s17 = smov (!%p125_p9), [#allocation2]  }
  0x12   : > { %p485_p11 = scmp.ne.s32.totalorder (!%p125_p9), %s641_s6, %s484_s16 }
  0x14   : > { %p486_p12 = pnand (!%p125_p9), %p485_p11, %p604_p5 }
  0x15   : > { %s151_s21 = scalar_select %p150_p10, %s587_s13, 1 }
  0x16   : > { %s647_s13 = scalar_lea.sflag [#allocation3], %s147_s30  ;;  %p487_p13 = pneg %p486_p12 }
  0x17   : > { %s416_s22 = sshll.u32 %s151_s21, 6  ;;  %s402_s23 = sshll.u32 %s151_s21, 3 }
  0x18   : > { %s154_s26 = scalar_lea.vmem %s688_s0, %s416_s22  ;;  %s158_s29 = scalar_lea.vmem %s689_s1, %s402_s23 }
  0x19   : > { %v167_v0 = vld [vmem:[%s158_s29] sm:$0xff]  ;;  %v160_v3 = vld [vmem:[%s154_s26 + $0x8] sm:$0xff]  ;;  %v161_v5 = vld [vmem:[%s154_s26 + $0x10] sm:$0xff]  ;;  %s488_s21 = sshll.u32 %s548_s17, 4  ;;  %s489_s21 = int_to_ptr.vmem [resolvable:$false] %s488_s21 }
  0x1a   : > { %v159_v1 = vld [vmem:[%s154_s26] sm:$0xff]  ;;  %427 = vmatprep.subr.mxu0 %v167_v0  ;;  %441 = vmatprep.subr.mxu1 %v167_v0  ;;  %v164_v4 = vld [vmem:[%s154_s26 + $0x28] sm:$0xff]  ;;  %v165_v6 = vld [vmem:[%s154_s26 + $0x30] sm:$0xff]  ;;  %s490_s22 = scalar_lea.vmem %s489_s21, 2048  ;;  %p491_p0 = scmp.lt.s32.totalorder %s641_s6, %s489_s21 }
  0x1b   : > { %v163_v2 = vld [vmem:[%s154_s26 + $0x20] sm:$0xff]  ;;  %428 = vmatpush3.msra.mxu0 %v167_v0  ;;  %442 = vmatpush3.msra.mxu1 %v167_v0  ;;  %v162_v7 = vld [vmem:[%s154_s26 + $0x18] sm:$0xff]  ;;  %p492_p1 = scmp.lt.s32.totalorder %s490_s22, %s484_s16 }
  0x1c   : > { %429 = vmatprep.mubr.msk.f32.mxu0 %vm168_vm0, %v159_v1  ;;  %435 = vmatprep.mubr.msk.f32.mxu1 %vm168_vm0, %v163_v2  ;;  %v166_v8 = vld [vmem:[%s154_s26 + $0x38] sm:$0xff] }
  0x1d   : > { %430 = vmatmul.mubr.msk.f32.vlgmr.msra.gmra.mrb[0].mxu0 %vm168_vm0, %v160_v3  ;;  %436 = vmatmul.mubr.msk.f32.vlgmr.msra.gmra.mrb[0].mxu1 %vm168_vm0, %v164_v4  ;;  %p493_p2 = por %p492_p1, %p491_p0 }
  0x1e   : > { %432 = vmatprep.mubr.msk.f32.mxu0 %vm168_vm0, %v161_v5  ;;  %438 = vmatprep.mubr.msk.f32.mxu1 %vm168_vm0, %v165_v6 }
  0x1f   : > { %p494_p3 = pnand %p493_p2, %p487_p13 }
  0x21   : > { %433 = vmatmul.mubr.msk.f32.gmra.mrb[2].mxu0 %vm168_vm0, %v162_v7  ;;  %439 = vmatmul.mubr.msk.f32.gmra.mrb[2].mxu1 %vm168_vm0, %v166_v8 }
  0xf0   : > { %v431_v9 = vpop.f32.mrb[0].mxu0  ;;  %v437_v10 = vpop.f32.mrb[0].mxu1 }
  0xf1   : > { %300 = vst.msk [vmem:[%s149_s5 + $0x8] sm:$0xff] %vm298_vm1, %v431_v9  ;;  %304 = vst.msk [vmem:[%s149_s5 + $0x28] sm:$0xff] %vm298_vm1, %v437_v10  ;;  %v259_v11 = vpop.f32.mrb[1].mxu0  ;;  %v279_v12 = vpop.f32.mrb[1].mxu1 }
  0xf2   : > { %299 = vst.msk [vmem:[%s149_s5] sm:$0xff] %vm298_vm1, %v259_v11  ;;  %303 = vst.msk [vmem:[%s149_s5 + $0x20] sm:$0xff] %vm298_vm1, %v279_v12 }
  0xf4   : > { %v434_v13 = vpop.f32.mrb[2].mxu0  ;;  %v440_v14 = vpop.f32.mrb[2].mxu1 }
  0xf5   : > { %302 = vst.msk [vmem:[%s149_s5 + $0x18] sm:$0xff] %vm298_vm1, %v434_v13  ;;  %306 = vst.msk [vmem:[%s149_s5 + $0x38] sm:$0xff] %vm298_vm1, %v440_v14  ;;  %v269_v15 = vpop.f32.mrb[3].mxu0  ;;  %v289_v16 = vpop.f32.mrb[3].mxu1 }
  0xf6   : > { %301 = vst.msk [vmem:[%s149_s5 + $0x10] sm:$0xff] %vm298_vm1, %v269_v15  ;;  %305 = vst.msk [vmem:[%s149_s5 + $0x30] sm:$0xff] %vm298_vm1, %v289_v16 }
  0xf7   : > { %497 = shalt.err (!%p494_p3)
}
  0xf8   : > { %s498_s23 = scalar_lea.hbm %s639_s14, 1024  ;;  %s502_s26 = scalar_lea.hbm %s690_s2, 2048 }
  0xf9   : > { %p499_p4 = scmp.ne.s32.totalorder %s639_s14, %s498_s23  ;;  %p503_p9 = scmp.lt.u32.totalorder %s639_s14, %s690_s2 }
  0xfa   : > { %p504_p10 = scmp.lt.u32.totalorder %s502_s26, %s498_s23  ;;  %p506_p12 = scmp.lt.u32.totalorder %s498_s23, %s639_s14 }
  0xfb   : > { %p500_p7 = pnand %p499_p4, %p604_p5 }
  0xfc   : > { %p505_p11 = por %p504_p10, %p503_p9 }
  0xfd   : > { %p501_p8 = pneg %p500_p7 }
  0xfe   : > { %p507_p13 = por %p506_p12, %p505_p11 }
 0x100   : > { %p508_p0 = pnand %p507_p13, %p501_p8 }
 0x102   : > { %511 = shalt.err (!%p508_p0)
}
 0x103   : > { %s549_s29 = smov 128   ;;  %s550_s30 = smov 8  }
 0x104   : > { %443 = dma.vmem_to_hbm [thread:$0]  (%p604_p5), %s641_s6, 1024, %s639_s14, %s647_s13, %s549_s29, %s549_s29, %s550_s30  }
 0x105 PF: > { %p449_p1 = scmp.ge.s32.totalorder %s546_s12, 2  ;;  %s336_s3 = sand.u32 1, %s534_s9  }
 0x106   : > { %s337_s4 = scalar_lea.sflag [#allocation3], %s336_s3 }
 0x107   : > { %p446_p2 = pnand %p449_p1, %p608_p6 }
 0x109   : > { %529 = dma.done.wait (!%p446_p2), %s337_s4, 1024  }
 0x10a   : > { %531 = vsyncadd (!%p446_p2), %s337_s4, 4294966272  ;;  %p12_p3 = scmp.ge.s32.totalorder %s591_s15, 4   ;;  %s693_s9 = smov %s538_s10 }
 0x10b   : > { %s694_s10 = smov %s542_s11  ;;  %s695_s11 = smov %s602_s18 }
 0x10c   : > { %s696_s12 = smov %s591_s15  ;;  %14 = sbr.rel (!%p12_p3) target bundleno = 3 (0x3), region = 66 }
 0x113   :  { %342 = vsyncpa [#allocation3], 1 }
 0x114   :  { %344 = vsyncpa [#allocation3 + $0x1], 1 }

</bundles_post_ra>
